<compile_context>
chip_gen: v5e
topology: v5e:2x2
jax: 0.10.0
libtpu: 0.0.40
codegen_flags: <defaults>
</compile_context>

<pallas_src>
import numpy as np
import jax
import jax.numpy as jnp
from jax.experimental import pallas as pl
from jax.experimental.pallas import tpu as pltpu

# ---------------- model config (small but structurally faithful) -------------
N_BATCH     = 2
N_BANDS     = 3                       # nBands
N_CHAN      = 6                       # nChan
N_TIME      = 32                      # nTime (divisible by strideFactor)
N_CLASS     = 4
M_BIG       = 8                       # m
SMALL_M     = 2                       # self.small_m
STRIDE_FACT = 4                       # strideFactor
IDX_LOCAL   = [2, 4]                  # idx_local_graph (sums to nChan)
IDX         = [3, 0, 5, 1, 2, 4]      # idx (permutation of channels)
G           = len(IDX_LOCAL)
F_OUT       = M_BIG * N_BANDS         # 24
M_MID       = SMALL_M * N_BANDS * G   # 12
K_IN        = N_BANDS * N_CHAN        # 18
TP          = N_TIME // STRIDE_FACT   # 8
RES_FACTOR  = 0.1
BN_EPS      = 1e-5

# batch-on-lanes widths
NK = N_BATCH * K_IN                   # 36
NM = N_BATCH * M_MID                  # 24
NF = N_BATCH * F_OUT                  # 48
NC = N_BATCH * N_CLASS                # 8
ZW = 2 * NM + NF                      # 96  (merged stage-1 matmul width)
S  = STRIDE_FACT
SS = S * S                            # 16
LANES = 128


def _ru8(n):
    return (n + 7) // 8 * 8


# -------- single parameter slab: row offsets (all 8-aligned) ------------------
OFF_WCAT  = 0                         # (NK, ZW)        stage-1 merged weight
OFF_WALL  = OFF_WCAT  + _ru8(NK)      # (NM, NF)        linear_all (block diag)
OFF_PT    = OFF_WALL  + _ru8(NM)      # (2S, 2T)        variance pooling matrix
OFF_RLV   = OFF_PT    + _ru8(2 * S)   # (2*S*S, S)      lv replication matrix
OFF_G2    = OFF_RLV   + _ru8(2 * SS)  # (2S, 2*S*S)     attention pooling matrix
OFF_WCLS  = OFF_G2    + _ru8(2 * S)   # (NF, S*NC)      classifier weight
OFF_DMASK = OFF_WCLS  + _ru8(NF)      # (S, S*NC)       stride-selection mask
OFF_VP    = OFF_DMASK + _ru8(S)       # (16, NF)        packed per-lane rows
N_VP_ROWS = 16
SLAB_ROWS = OFF_VP + N_VP_ROWS        # 184

(ROW_SCB_SCALE, ROW_SCB_SHIFT, ROW_B_RES_, ROW_B_ALL, ROW_B_RES,
 ROW_WQ, ROW_WK, ROW_WV, ROW_BQ, ROW_BK, ROW_BV, ROW_WO, ROW_BO,
 ROW_BEFF) = range(14)


# ------------------------------ helpers --------------------------------------
def renorm_rows(w, max_norm):
    """torch.renorm(w, p=2, dim=0, maxnorm=max_norm) for 2-D weights."""
    norms = np.sqrt(np.sum(w * w, axis=1, keepdims=True))
    scale = np.where(norms > max_norm, max_norm / (norms + 1e-7), 1.0)
    return (w * scale).astype(np.float32)


def _full_spec(shape):
    nd = len(shape)
    return pl.BlockSpec(shape, lambda i, _nd=nd: (0,) * _nd)


# ------------------------------ fused kernel ---------------------------------
def _se_fbcnet_kernel(x2_ref, slab_ref, out_ref):
    # --- static views into the single parameter slab (one DMA for all params)
    wcat  = slab_ref[OFF_WCAT:OFF_WCAT + NK, 0:ZW]          # (36, 96)
    wall  = slab_ref[OFF_WALL:OFF_WALL + NM, 0:NF]          # (24, 48)
    ptm   = slab_ref[OFF_PT:OFF_PT + 2 * S, 0:2 * N_TIME]   # (8, 64)
    rlv   = slab_ref[OFF_RLV:OFF_RLV + 2 * SS, 0:S]         # (32, 4)
    g2    = slab_ref[OFF_G2:OFF_G2 + 2 * S, 0:2 * SS]       # (8, 32)
    wcls  = slab_ref[OFF_WCLS:OFF_WCLS + NF, 0:S * NC]      # (48, 32)
    dmask = slab_ref[OFF_DMASK:OFF_DMASK + S, 0:S * NC]     # (4, 32)
    vp    = slab_ref[OFF_VP:OFF_VP + N_VP_ROWS, 0:NF]       # (16, 48)

    def prow(r, width=NF):
        return vp[r:r + 1, 0:width]

    # ---------------- stage 1: SCB (+BN fold, swish) + residual/linear_all ---
    # x2: (T, N*K).  One merged MXU push for [SCB | linear_residual_ | linear_residual],
    # block-diagonal per batch (batch lives on the lane axis).
    x2 = x2_ref[...]                                                   # (32, 36)
    z = jnp.dot(x2, wcat, preferred_element_type=jnp.float32)          # (32, 96)

    pre = z[:, 0:NM] * prow(ROW_SCB_SCALE, NM) + prow(ROW_SCB_SHIFT, NM)
    xr = pre / (1.0 + jnp.exp(-pre))                                   # swish (exact)
    r2 = (z[:, NM:2 * NM] + prow(ROW_B_RES_, NM)) * RES_FACTOR         # linear_residual_
    r1 = (z[:, 2 * NM:2 * NM + NF] + prow(ROW_B_RES)) * RES_FACTOR     # linear_residual

    feat = (jnp.dot(xr + r2, wall, preferred_element_type=jnp.float32)
            + prow(ROW_B_ALL) + r1)                                    # (32, 48)

    # ---------------- stage 2: per-window unbiased log-variance (1 MXU push) -
    fcat = jnp.concatenate([feat, feat * feat], axis=0)                # (64, 48)
    pooled = jnp.dot(ptm, fcat, preferred_element_type=jnp.float32)    # (8, 48)
    s1 = pooled[0:S, :]                                                # window sums
    s2 = pooled[S:2 * S, :]                                            # window sums of squares
    mu = s1 * (1.0 / TP)
    var = (s2 - s1 * mu) * (1.0 / (TP - 1))                            # unbiased (torch default)
    lv = jnp.log(jnp.clip(var, 1e-6, 1e6))                             # torch.clamp(1e-6, 1e6)

    # ---------------- stage 3: per-feature embed_dim=1 attention -------------
    # One replication matmul builds all (query, key) pairs; one pooling matmul
    # produces the softmax numerators / denominators for every query at once.
    lvrep = jnp.dot(rlv, lv, preferred_element_type=jnp.float32)       # (32, 48)
    lq = lvrep[0:SS, :]          # row i*S+j holds lv[i]  (query pattern)
    lk = lvrep[SS:2 * SS, :]     # row i*S+j holds lv[j]  (key pattern)
    qrep = lq * prow(ROW_WQ) + prow(ROW_BQ)
    krep = lk * prow(ROW_WK) + prow(ROW_BK)
    vrep = lk * prow(ROW_WV) + prow(ROW_BV)
    scores = qrep * krep                                               # scale = 1/sqrt(1) = 1
    smax = jnp.max(scores, axis=0, keepdims=True)                      # global max: softmax-invariant
    e = jnp.exp(scores - smax)
    ecat = jnp.concatenate([e, e * vrep], axis=0)                      # (32, 48)
    pooled2 = jnp.dot(g2, ecat, preferred_element_type=jnp.float32)    # (8, 48)
    den = pooled2[0:S, :]
    num = pooled2[S:2 * S, :]
    oi = num / den                                                     # exact divide
    fi = oi * prow(ROW_WO) + prow(ROW_BO)                              # (S, N*F) attention output

    # ---------------- stage 4: classifier (1 MXU push) + LogSoftmax ----------
    m = jnp.dot(fi, wcls, preferred_element_type=jnp.float32)          # (4, 32)
    zsel = jnp.sum(m * dmask, axis=0, keepdims=True)                   # (1, 32)  pick row s for block s
    logits = prow(ROW_BEFF, NC)                                        # (1, 8) = b_last tiled per batch
    for s in range(S):
        logits = logits + zsel[:, s * NC:(s + 1) * NC]                 # sum over strides

    for n in range(N_BATCH):                                           # tiny tail (2 rows)
        row = logits[:, n * N_CLASS:(n + 1) * N_CLASS]                 # (1, 4)
        mz = jnp.max(row, axis=-1, keepdims=True)
        lse = jnp.log(jnp.sum(jnp.exp(row - mz), axis=-1, keepdims=True)) + mz
        out_ref[n:n + 1, :] = row - lse                                # direct store, no concat


# --------------------------- parameters --------------------------------------
def make_params(key):
    keys = jax.random.split(key, 16)
    sm_nb = SMALL_M * N_BANDS

    # SCB per group: Conv2dWithConstraint(nBands, small_m*nBands, (cw,1),
    # groups=nBands, bias=True, max_norm=2) + BatchNorm2d (eval-mode fold) + swish
    conv_w, conv_b = [], []
    for g, cw in enumerate(IDX_LOCAL):
        kw, kb = jax.random.split(keys[g])
        w = np.asarray(jax.random.normal(kw, (sm_nb, cw), jnp.float32)) * 0.5
        w = renorm_rows(w, 2.0)
        b = np.asarray(jax.random.normal(kb, (sm_nb,), jnp.float32)) * 0.1
        conv_w.append(w)
        conv_b.append(b)

    # BN params (PyTorch eval-mode defaults: gamma=1, beta=0, rm=0, rv=1)
    bn_gamma = np.ones(sm_nb, np.float32)
    bn_beta = np.zeros(sm_nb, np.float32)
    bn_rm = np.zeros(sm_nb, np.float32)
    bn_rv = np.ones(sm_nb, np.float32)

    # Fold all grouped convs into one block-diagonal matmul weight.
    wblk = np.zeros((K_IN, M_MID), np.float32)
    scb_scale = np.zeros((M_MID,), np.float32)
    scb_shift = np.zeros((M_MID,), np.float32)
    idx_start = 0
    for g, cw in enumerate(IDX_LOCAL):
        idx_g = IDX[idx_start:idx_start + cw]
        idx_start += cw
        alpha = bn_gamma / np.sqrt(bn_rv + BN_EPS)
        shift = (conv_b[g] - bn_rm) * alpha + bn_beta
        for b in range(N_BANDS):
            for j in range(SMALL_M):
                oc = b * SMALL_M + j
                col = oc * G + g                        # x_results.reshape ordering
                scb_scale[col] = alpha[oc]
                scb_shift[col] = shift[oc]
                for c in range(cw):
                    row = b * N_CHAN + idx_g[c]         # x.reshape(N, nBands*nChan, T) order
                    wblk[row, col] = conv_w[g][oc, c]

    w_res  = np.asarray(jax.random.normal(keys[4], (F_OUT, K_IN), jnp.float32)) * 0.1
    b_res  = np.asarray(jax.random.normal(keys[5], (F_OUT,), jnp.float32)) * 0.1
    w_res_ = np.asarray(jax.random.normal(keys[6], (M_MID, K_IN), jnp.float32)) * 0.1
    b_res_ = np.asarray(jax.random.normal(keys[7], (M_MID,), jnp.float32)) * 0.1
    w_all  = np.asarray(jax.random.normal(keys[8], (F_OUT, M_MID), jnp.float32)) * 0.1
    b_all  = np.asarray(jax.random.normal(keys[9], (F_OUT,), jnp.float32)) * 0.1

    # per-feature MultiheadAttention(embed_dim=1): rows [wq, wk, wv, bq, bk, bv, wo, bo]
    attn_p = np.asarray(jax.random.normal(keys[10], (8, F_OUT), jnp.float32)) * 0.5

    # LastBlock: LinearWithConstraint(F*S, nClass, max_norm=0.5) + LogSoftmax
    w_last = np.asarray(jax.random.normal(keys[11], (N_CLASS, F_OUT * STRIDE_FACT),
                                          jnp.float32)) * 0.3
    w_last = renorm_rows(w_last, 0.5)
    b_last = np.asarray(jax.random.normal(keys[12], (N_CLASS,), jnp.float32)) * 0.1

    # ---- batch-on-lanes block-diagonal weights -------------------------------
    wcat = np.zeros((NK, ZW), np.float32)               # [SCB | res_^T | res^T] per batch
    wall_bd = np.zeros((NM, NF), np.float32)
    for n in range(N_BATCH):
        rk = slice(n * K_IN, (n + 1) * K_IN)
        wcat[rk, n * M_MID:(n + 1) * M_MID] = wblk
        wcat[rk, NM + n * M_MID:NM + (n + 1) * M_MID] = w_res_.T
        wcat[rk, 2 * NM + n * F_OUT:2 * NM + (n + 1) * F_OUT] = w_res.T
        wall_bd[n * M_MID:(n + 1) * M_MID, n * F_OUT:(n + 1) * F_OUT] = w_all.T

    # variance pooling matrix: rows 0..S-1 -> window sums, rows S..2S-1 -> window sumsq
    ptm = np.zeros((2 * S, 2 * N_TIME), np.float32)
    for s in range(S):
        ptm[s, s * TP:(s + 1) * TP] = 1.0
        ptm[S + s, N_TIME + s * TP:N_TIME + (s + 1) * TP] = 1.0

    # lv replication matrix: rows 0..15 query pattern (row i*S+j <- lv[i]),
    # rows 16..31 key pattern (row i*S+j <- lv[j])
    rlv = np.zeros((2 * SS, S), np.float32)
    for i in range(S):
        for j in range(S):
            rlv[i * S + j, i] = 1.0
            rlv[SS + i * S + j, j] = 1.0

    # attention pooling: rows 0..S-1 softmax denominators, rows S..2S-1 numerators
    g2 = np.zeros((2 * S, 2 * SS), np.float32)
    for i in range(S):
        for j in range(S):
            g2[i, i * S + j] = 1.0
            g2[S + i, SS + i * S + j] = 1.0

    # classifier weight, columns ordered (stride, batch, class); block diag per batch
    wcls = np.zeros((NF, S * NC), np.float32)
    for n in range(N_BATCH):
        for f in range(F_OUT):
            for s in range(S):
                for c in range(N_CLASS):
                    wcls[n * F_OUT + f, s * NC + n * N_CLASS + c] = w_last[c, f * STRIDE_FACT + s]
    dmask = np.zeros((S, S * NC), np.float32)            # select column block s from row s
    for s in range(S):
        dmask[s, s * NC:(s + 1) * NC] = 1.0

    # packed per-lane parameter rows (tiled across the batch-on-lanes axis)
    vp = np.zeros((N_VP_ROWS, NF), np.float32)
    vp[ROW_SCB_SCALE, :NM] = np.tile(scb_scale, N_BATCH)
    vp[ROW_SCB_SHIFT, :NM] = np.tile(scb_shift, N_BATCH)
    vp[ROW_B_RES_,    :NM] = np.tile(b_res_, N_BATCH)
    vp[ROW_B_ALL,     :NF] = np.tile(b_all, N_BATCH)
    vp[ROW_B_RES,     :NF] = np.tile(b_res, N_BATCH)
    for r in range(8):
        vp[ROW_WQ + r, :NF] = np.tile(attn_p[r], N_BATCH)
    vp[ROW_BEFF, :NC] = np.tile(b_last, N_BATCH)

    # single lane-padded f32 slab (one DMA descriptor for every parameter)
    slab = np.zeros((SLAB_ROWS, LANES), np.float32)
    slab[OFF_WCAT:OFF_WCAT + NK, :ZW] = wcat
    slab[OFF_WALL:OFF_WALL + NM, :NF] = wall_bd
    slab[OFF_PT:OFF_PT + 2 * S, :2 * N_TIME] = ptm
    slab[OFF_RLV:OFF_RLV + 2 * SS, :S] = rlv
    slab[OFF_G2:OFF_G2 + 2 * S, :2 * SS] = g2
    slab[OFF_WCLS:OFF_WCLS + NF, :S * NC] = wcls
    slab[OFF_DMASK:OFF_DMASK + S, :S * NC] = dmask
    slab[OFF_VP:OFF_VP + N_VP_ROWS, :NF] = vp

    raw = dict(conv_w=conv_w, conv_b=conv_b, w_res=w_res, b_res=b_res,
               w_res_=w_res_, b_res_=b_res_, w_all=w_all, b_all=b_all,
               attn_p=attn_p, w_last=w_last, b_last=b_last)
    return jnp.asarray(slab), raw


# ------------------------------ forward --------------------------------------
def se_fbcnet_forward(x, slab):
    assert x.shape == (N_BATCH, N_BANDS, N_CHAN, N_TIME), x.shape
    # (N, nBands, nChan, T) -> (T, N, nBands*nChan) -> (T, N*K): batch on lanes
    x2 = x.reshape(N_BATCH, K_IN, N_TIME).transpose(2, 0, 1).reshape(N_TIME, NK)

    # TODO(synk): the pos_embed addition in the PyTorch forward is dead code
    # (x_sliced is immediately overwritten before the attention call), so it
    # is intentionally not reproduced here.
    args = (x2, slab)
    return pl.pallas_call(
        _se_fbcnet_kernel,
        out_shape=jax.ShapeDtypeStruct((N_BATCH, N_CLASS), jnp.float32),
        grid=(1,),
        in_specs=[_full_spec(a.shape) for a in args],
        out_specs=_full_spec((N_BATCH, N_CLASS)),
        compiler_params=pltpu.CompilerParams(dimension_semantics=("arbitrary",)),
    )(*args)


# --------------------- pure numpy reference (float64) ------------------------
def reference_forward(x, raw):
    x = np.asarray(x, np.float64)
    N = x.shape[0]
    sm_nb = SMALL_M * N_BANDS

    # SCB branches (grouped conv + eval-mode BN + swish), cat along graph axis
    x_results = np.zeros((N, sm_nb, G, N_TIME))
    idx_start = 0
    for g, cw in enumerate(IDX_LOCAL):
        idx_g = IDX[idx_start:idx_start + cw]
        idx_start += cw
        w = raw["conv_w"][g].astype(np.float64)
        b = raw["conv_b"][g].astype(np.float64)
        for oc in range(sm_nb):
            band = oc // SMALL_M
            acc = b[oc] + np.einsum("c,nct->nt", w[oc], x[:, band, idx_g, :])
            acc = acc / np.sqrt(1.0 + BN_EPS)               # BN eval (default stats)
            x_results[:, oc, g, :] = acc / (1.0 + np.exp(-acc))  # swish
    x_results = x_results.reshape(N, sm_nb * G, N_TIME)

    xr = x.reshape(N, K_IN, N_TIME).transpose(0, 2, 1)      # (N, T, K)
    r1 = (xr @ raw["w_res"].T.astype(np.float64) + raw["b_res"]) * RES_FACTOR
    r2 = (xr @ raw["w_res_"].T.astype(np.float64) + raw["b_res_"]) * RES_FACTOR

    x_ = x_results.transpose(0, 2, 1) + r2
    x_ = x_ @ raw["w_all"].T.astype(np.float64) + raw["b_all"]
    x_ = (x_ + r1).transpose(0, 2, 1)                       # (N, F, T)

    xw = x_.reshape(N, F_OUT, STRIDE_FACT, TP)
    var = xw.var(axis=3, ddof=1)
    lv = np.log(np.clip(var, 1e-6, 1e6))                    # (N, F, S)

    attn = raw["attn_p"].astype(np.float64)
    out_feat = np.zeros((N, F_OUT, STRIDE_FACT))
    for f in range(F_OUT):
        wq, wk, wv, bq, bk, bv, wo, bo = attn[:, f]
        for n in range(N):
            seq = lv[n, f, :]
            q = seq * wq + bq
            k = seq * wk + bk
            v = seq * wv + bv
            sc = np.outer(q, k)
            sc = sc - sc.max(axis=1, keepdims=True)
            e = np.exp(sc)
            p = e / e.sum(axis=1, keepdims=True)
            out_feat[n, f, :] = (p @ v) * wo + bo

    flat = out_feat.reshape(N, F_OUT * STRIDE_FACT)         # index f*S + s
    logits = flat @ raw["w_last"].T.astype(np.float64) + raw["b_last"]
    mz = logits.max(axis=1, keepdims=True)
    return logits - (np.log(np.exp(logits - mz).sum(axis=1, keepdims=True)) + mz)


# ------------------------------- main ----------------------------------------
if __name__ == "__main__":
    key = jax.random.PRNGKey(0)
    k_param, k_x = jax.random.split(key)
    slab, raw = make_params(k_param)
    x = jax.random.normal(k_x, (N_BATCH, N_BANDS, N_CHAN, N_TIME), jnp.float32)

    fwd = jax.jit(se_fbcnet_forward)
    out = np.asarray(jax.block_until_ready(fwd(x, slab)))

    assert out.shape == (N_BATCH, N_CLASS), out.shape
    assert np.all(np.isfinite(out))
    # log-softmax rows should sum to ~1 after exp
    assert np.all(np.abs(np.sum(np.exp(out), axis=1) - 1.0) < 1e-4)
    # parity against a float64 numpy reference of the PyTorch forward
    ref = reference_forward(np.asarray(x), raw)
    np.testing.assert_allclose(out, ref, rtol=0.0, atol=5e-2)
    print("KERNEL_OK")
</pallas_src>

<mosaic_0001>
module attributes {stable_mosaic.version = 11 : i64} {
  func.func @_se_fbcnet_kernel(%arg0: i32, %arg1: memref<32x36xf32, #tpu.memory_space<vmem>>, %arg2: memref<184x128xf32, #tpu.memory_space<vmem>>, %arg3: memref<2x4xf32, #tpu.memory_space<vmem>>) attributes {dimension_semantics = [#tpu.dimension_semantics<arbitrary>], iteration_bounds = array<i64: 1>, scalar_prefetch = 0 : i64, scratch_operands = 0 : i64, tpu.core_type = #tpu.core_type<tc>, window_params = [{pipeline_mode = #tpu.pipeline_mode<synchronous>, transform_indices = @transform_0, window_bounds = array<i64: 32, 36>}, {pipeline_mode = #tpu.pipeline_mode<synchronous>, transform_indices = @transform_1, window_bounds = array<i64: 184, 128>}, {pipeline_mode = #tpu.pipeline_mode<synchronous>, transform_indices = @transform_2, window_bounds = array<i64: 2, 4>}]} {
    %c0 = arith.constant 0 : index
    %c0_0 = arith.constant 0 : index
    %0 = vector.load %arg2[%c0, %c0_0] : memref<184x128xf32, #tpu.memory_space<vmem>>, vector<36x96xf32>
    %c40 = arith.constant 40 : index
    %c0_1 = arith.constant 0 : index
    %1 = vector.load %arg2[%c40, %c0_1] : memref<184x128xf32, #tpu.memory_space<vmem>>, vector<24x48xf32>
    %c64 = arith.constant 64 : index
    %c0_2 = arith.constant 0 : index
    %2 = vector.load %arg2[%c64, %c0_2] : memref<184x128xf32, #tpu.memory_space<vmem>>, vector<8x64xf32>
    %c72 = arith.constant 72 : index
    %c0_3 = arith.constant 0 : index
    %3 = vector.load %arg2[%c72, %c0_3] : memref<184x128xf32, #tpu.memory_space<vmem>>, vector<32x4xf32>
    %c104 = arith.constant 104 : index
    %c0_4 = arith.constant 0 : index
    %4 = vector.load %arg2[%c104, %c0_4] : memref<184x128xf32, #tpu.memory_space<vmem>>, vector<8x32xf32>
    %c112 = arith.constant 112 : index
    %c0_5 = arith.constant 0 : index
    %5 = vector.load %arg2[%c112, %c0_5] : memref<184x128xf32, #tpu.memory_space<vmem>>, vector<48x32xf32>
    %c160 = arith.constant 160 : index
    %c0_6 = arith.constant 0 : index
    %6 = vector.load %arg2[%c160, %c0_6] : memref<184x128xf32, #tpu.memory_space<vmem>>, vector<4x32xf32>
    %c168 = arith.constant 168 : index
    %c0_7 = arith.constant 0 : index
    %7 = vector.load %arg2[%c168, %c0_7] : memref<184x128xf32, #tpu.memory_space<vmem>>, vector<16x48xf32>
    %c0_8 = arith.constant 0 : index
    %c0_9 = arith.constant 0 : index
    %8 = vector.load %arg1[%c0_8, %c0_9] : memref<32x36xf32, #tpu.memory_space<vmem>>, vector<32x36xf32>
    %cst = arith.constant dense<0.000000e+00> : vector<32x96xf32>
    %9 = tpu.matmul %8, %0, %cst {dimension_numbers = #tpu.dot_dimension_numbers<[1], [0], [0], [1], [0, 0, 1, 1], [], []>} : vector<32x36xf32>, vector<36x96xf32>, vector<32x96xf32> -> vector<32x96xf32>
    %10 = vector.extract_strided_slice %9 {offsets = [0, 0], sizes = [32, 24], strides = [1, 1]} : vector<32x96xf32> to vector<32x24xf32>
    %11 = vector.extract_strided_slice %7 {offsets = [0, 0], sizes = [1, 24], strides = [1, 1]} : vector<16x48xf32> to vector<1x24xf32>
    %12 = vector.broadcast %11 : vector<1x24xf32> to vector<32x24xf32>
    %13 = arith.mulf %10, %12 : vector<32x24xf32>
    %14 = vector.extract_strided_slice %7 {offsets = [1, 0], sizes = [1, 24], strides = [1, 1]} : vector<16x48xf32> to vector<1x24xf32>
    %15 = vector.broadcast %14 : vector<1x24xf32> to vector<32x24xf32>
    %16 = arith.addf %13, %15 : vector<32x24xf32>
    %cst_10 = arith.constant 0.000000e+00 : f32
    %17 = vector.broadcast %cst_10 : f32 to vector<32x24xf32>
    %18 = arith.subf %17, %16 : vector<32x24xf32>
    %19 = math.exp %18 : vector<32x24xf32>
    %cst_11 = arith.constant 1.000000e+00 : f32
    %20 = vector.broadcast %cst_11 : f32 to vector<32x24xf32>
    %21 = arith.addf %20, %19 : vector<32x24xf32>
    %22 = arith.divf %16, %21 : vector<32x24xf32>
    %23 = vector.extract_strided_slice %9 {offsets = [0, 24], sizes = [32, 24], strides = [1, 1]} : vector<32x96xf32> to vector<32x24xf32>
    %24 = vector.extract_strided_slice %7 {offsets = [2, 0], sizes = [1, 24], strides = [1, 1]} : vector<16x48xf32> to vector<1x24xf32>
    %25 = vector.broadcast %24 : vector<1x24xf32> to vector<32x24xf32>
    %26 = arith.addf %23, %25 : vector<32x24xf32>
    %cst_12 = arith.constant 1.000000e-01 : f32
    %27 = vector.broadcast %cst_12 : f32 to vector<32x24xf32>
    %28 = arith.mulf %26, %27 : vector<32x24xf32>
    %29 = vector.extract_strided_slice %9 {offsets = [0, 48], sizes = [32, 48], strides = [1, 1]} : vector<32x96xf32> to vector<32x48xf32>
    %30 = vector.extract_strided_slice %7 {offsets = [4, 0], sizes = [1, 48], strides = [1, 1]} : vector<16x48xf32> to vector<1x48xf32>
    %31 = vector.broadcast %30 : vector<1x48xf32> to vector<32x48xf32>
    %32 = arith.addf %29, %31 : vector<32x48xf32>
    %cst_13 = arith.constant 1.000000e-01 : f32
    %33 = vector.broadcast %cst_13 : f32 to vector<32x48xf32>
    %34 = arith.mulf %32, %33 : vector<32x48xf32>
    %35 = arith.addf %22, %28 : vector<32x24xf32>
    %cst_14 = arith.constant dense<0.000000e+00> : vector<32x48xf32>
    %36 = tpu.matmul %35, %1, %cst_14 {dimension_numbers = #tpu.dot_dimension_numbers<[1], [0], [0], [1], [0, 0, 1, 1], [], []>} : vector<32x24xf32>, vector<24x48xf32>, vector<32x48xf32> -> vector<32x48xf32>
    %37 = vector.extract_strided_slice %7 {offsets = [3, 0], sizes = [1, 48], strides = [1, 1]} : vector<16x48xf32> to vector<1x48xf32>
    %38 = vector.broadcast %37 : vector<1x48xf32> to vector<32x48xf32>
    %39 = arith.addf %36, %38 : vector<32x48xf32>
    %40 = arith.addf %39, %34 : vector<32x48xf32>
    %41 = arith.mulf %40, %40 : vector<32x48xf32>
    %42 = tpu.concatenate %40, %41 in 0 : vector<32x48xf32>, vector<32x48xf32> -> vector<64x48xf32>
    %cst_15 = arith.constant dense<0.000000e+00> : vector<8x48xf32>
    %43 = tpu.matmul %2, %42, %cst_15 {dimension_numbers = #tpu.dot_dimension_numbers<[1], [0], [0], [1], [0, 0, 1, 1], [], []>} : vector<8x64xf32>, vector<64x48xf32>, vector<8x48xf32> -> vector<8x48xf32>
    %44 = vector.extract_strided_slice %43 {offsets = [0, 0], sizes = [4, 48], strides = [1, 1]} : vector<8x48xf32> to vector<4x48xf32>
    %45 = vector.extract_strided_slice %43 {offsets = [4, 0], sizes = [4, 48], strides = [1, 1]} : vector<8x48xf32> to vector<4x48xf32>
    %cst_16 = arith.constant 1.250000e-01 : f32
    %46 = vector.broadcast %cst_16 : f32 to vector<4x48xf32>
    %47 = arith.mulf %44, %46 : vector<4x48xf32>
    %48 = arith.mulf %44, %47 : vector<4x48xf32>
    %49 = arith.subf %45, %48 : vector<4x48xf32>
    %cst_17 = arith.constant 0.142857149 : f32
    %50 = vector.broadcast %cst_17 : f32 to vector<4x48xf32>
    %51 = arith.mulf %49, %50 : vector<4x48xf32>
    %cst_18 = arith.constant 9.99999997E-7 : f32
    %cst_19 = arith.constant 1.000000e+06 : f32
    %52 = vector.broadcast %cst_18 : f32 to vector<4x48xf32>
    %53 = arith.maximumf %52, %51 : vector<4x48xf32>
    %54 = vector.broadcast %cst_19 : f32 to vector<4x48xf32>
    %55 = arith.minimumf %54, %53 : vector<4x48xf32>
    %56 = math.log %55 : vector<4x48xf32>
    %cst_20 = arith.constant dense<0.000000e+00> : vector<32x48xf32>
    %57 = tpu.matmul %3, %56, %cst_20 {dimension_numbers = #tpu.dot_dimension_numbers<[1], [0], [0], [1], [0, 0, 1, 1], [], []>} : vector<32x4xf32>, vector<4x48xf32>, vector<32x48xf32> -> vector<32x48xf32>
    %58 = vector.extract_strided_slice %57 {offsets = [0, 0], sizes = [16, 48], strides = [1, 1]} : vector<32x48xf32> to vector<16x48xf32>
    %59 = vector.extract_strided_slice %57 {offsets = [16, 0], sizes = [16, 48], strides = [1, 1]} : vector<32x48xf32> to vector<16x48xf32>
    %60 = vector.extract_strided_slice %7 {offsets = [5, 0], sizes = [1, 48], strides = [1, 1]} : vector<16x48xf32> to vector<1x48xf32>
    %61 = vector.broadcast %60 : vector<1x48xf32> to vector<16x48xf32>
    %62 = arith.mulf %58, %61 : vector<16x48xf32>
    %63 = vector.extract_strided_slice %7 {offsets = [8, 0], sizes = [1, 48], strides = [1, 1]} : vector<16x48xf32> to vector<1x48xf32>
    %64 = vector.broadcast %63 : vector<1x48xf32> to vector<16x48xf32>
    %65 = arith.addf %62, %64 : vector<16x48xf32>
    %66 = vector.extract_strided_slice %7 {offsets = [6, 0], sizes = [1, 48], strides = [1, 1]} : vector<16x48xf32> to vector<1x48xf32>
    %67 = vector.broadcast %66 : vector<1x48xf32> to vector<16x48xf32>
    %68 = arith.mulf %59, %67 : vector<16x48xf32>
    %69 = vector.extract_strided_slice %7 {offsets = [9, 0], sizes = [1, 48], strides = [1, 1]} : vector<16x48xf32> to vector<1x48xf32>
    %70 = vector.broadcast %69 : vector<1x48xf32> to vector<16x48xf32>
    %71 = arith.addf %68, %70 : vector<16x48xf32>
    %72 = vector.extract_strided_slice %7 {offsets = [7, 0], sizes = [1, 48], strides = [1, 1]} : vector<16x48xf32> to vector<1x48xf32>
    %73 = vector.broadcast %72 : vector<1x48xf32> to vector<16x48xf32>
    %74 = arith.mulf %59, %73 : vector<16x48xf32>
    %75 = vector.extract_strided_slice %7 {offsets = [10, 0], sizes = [1, 48], strides = [1, 1]} : vector<16x48xf32> to vector<1x48xf32>
    %76 = vector.broadcast %75 : vector<1x48xf32> to vector<16x48xf32>
    %77 = arith.addf %74, %76 : vector<16x48xf32>
    %78 = arith.mulf %65, %71 : vector<16x48xf32>
    %cst_21 = arith.constant dense<0xFF800000> : vector<48xf32>
    %79 = vector.multi_reduction <maximumf>, %78, %cst_21 [0] : vector<16x48xf32> to vector<48xf32>
    %80 = vector.shape_cast %79 : vector<48xf32> to vector<1x48xf32>
    %81 = vector.broadcast %80 : vector<1x48xf32> to vector<16x48xf32>
    %82 = arith.subf %78, %81 : vector<16x48xf32>
    %83 = math.exp %82 : vector<16x48xf32>
    %84 = arith.mulf %83, %77 : vector<16x48xf32>
    %85 = tpu.concatenate %83, %84 in 0 : vector<16x48xf32>, vector<16x48xf32> -> vector<32x48xf32>
    %cst_22 = arith.constant dense<0.000000e+00> : vector<8x48xf32>
    %86 = tpu.matmul %4, %85, %cst_22 {dimension_numbers = #tpu.dot_dimension_numbers<[1], [0], [0], [1], [0, 0, 1, 1], [], []>} : vector<8x32xf32>, vector<32x48xf32>, vector<8x48xf32> -> vector<8x48xf32>
    %87 = vector.extract_strided_slice %86 {offsets = [0, 0], sizes = [4, 48], strides = [1, 1]} : vector<8x48xf32> to vector<4x48xf32>
    %88 = vector.extract_strided_slice %86 {offsets = [4, 0], sizes = [4, 48], strides = [1, 1]} : vector<8x48xf32> to vector<4x48xf32>
    %89 = arith.divf %88, %87 : vector<4x48xf32>
    %90 = vector.extract_strided_slice %7 {offsets = [11, 0], sizes = [1, 48], strides = [1, 1]} : vector<16x48xf32> to vector<1x48xf32>
    %91 = vector.broadcast %90 : vector<1x48xf32> to vector<4x48xf32>
    %92 = arith.mulf %89, %91 : vector<4x48xf32>
    %93 = vector.extract_strided_slice %7 {offsets = [12, 0], sizes = [1, 48], strides = [1, 1]} : vector<16x48xf32> to vector<1x48xf32>
    %94 = vector.broadcast %93 : vector<1x48xf32> to vector<4x48xf32>
    %95 = arith.addf %92, %94 : vector<4x48xf32>
    %cst_23 = arith.constant dense<0.000000e+00> : vector<4x32xf32>
    %96 = tpu.matmul %95, %5, %cst_23 {dimension_numbers = #tpu.dot_dimension_numbers<[1], [0], [0], [1], [0, 0, 1, 1], [], []>} : vector<4x48xf32>, vector<48x32xf32>, vector<4x32xf32> -> vector<4x32xf32>
    %97 = arith.mulf %96, %6 : vector<4x32xf32>
    %cst_24 = arith.constant dense<0.000000e+00> : vector<32xf32>
    %98 = vector.multi_reduction <add>, %97, %cst_24 [0] : vector<4x32xf32> to vector<32xf32>
    %99 = vector.shape_cast %98 : vector<32xf32> to vector<1x32xf32>
    %100 = vector.extract_strided_slice %7 {offsets = [13, 0], sizes = [1, 8], strides = [1, 1]} : vector<16x48xf32> to vector<1x8xf32>
    %101 = vector.extract_strided_slice %99 {offsets = [0, 0], sizes = [1, 8], strides = [1, 1]} : vector<1x32xf32> to vector<1x8xf32>
    %102 = arith.addf %100, %101 : vector<1x8xf32>
    %103 = vector.extract_strided_slice %99 {offsets = [0, 8], sizes = [1, 8], strides = [1, 1]} : vector<1x32xf32> to vector<1x8xf32>
    %104 = arith.addf %102, %103 : vector<1x8xf32>
    %105 = vector.extract_strided_slice %99 {offsets = [0, 16], sizes = [1, 8], strides = [1, 1]} : vector<1x32xf32> to vector<1x8xf32>
    %106 = arith.addf %104, %105 : vector<1x8xf32>
    %107 = vector.extract_strided_slice %99 {offsets = [0, 24], sizes = [1, 8], strides = [1, 1]} : vector<1x32xf32> to vector<1x8xf32>
    %108 = arith.addf %106, %107 : vector<1x8xf32>
    %109 = vector.extract_strided_slice %108 {offsets = [0, 0], sizes = [1, 4], strides = [1, 1]} : vector<1x8xf32> to vector<1x4xf32>
    %cst_25 = arith.constant dense<0xFF800000> : vector<1xf32>
    %110 = vector.multi_reduction <maximumf>, %109, %cst_25 [1] : vector<1x4xf32> to vector<1xf32>
    %111 = vector.shape_cast %110 : vector<1xf32> to vector<1x1xf32>
    %112 = vector.broadcast %111 : vector<1x1xf32> to vector<1x4xf32>
    %113 = arith.subf %109, %112 : vector<1x4xf32>
    %114 = math.exp %113 : vector<1x4xf32>
    %cst_26 = arith.constant dense<0.000000e+00> : vector<1xf32>
    %115 = vector.multi_reduction <add>, %114, %cst_26 [1] : vector<1x4xf32> to vector<1xf32>
    %116 = vector.shape_cast %115 : vector<1xf32> to vector<1x1xf32>
    %117 = math.log %116 : vector<1x1xf32>
    %118 = arith.addf %117, %111 : vector<1x1xf32>
    %119 = vector.broadcast %118 : vector<1x1xf32> to vector<1x4xf32>
    %120 = arith.subf %109, %119 : vector<1x4xf32>
    %c0_27 = arith.constant 0 : index
    %c0_28 = arith.constant 0 : index
    %121 = vector.load %arg3[%c0_27, %c0_28] : memref<2x4xf32, #tpu.memory_space<vmem>>, vector<1x4xf32>
    tpu.vector_store %arg3[%c0_27, %c0_28], %120 {strides = array<i32>} : memref<2x4xf32, #tpu.memory_space<vmem>>, vector<1x4xf32>,
    %122 = vector.extract_strided_slice %108 {offsets = [0, 4], sizes = [1, 4], strides = [1, 1]} : vector<1x8xf32> to vector<1x4xf32>
    %cst_29 = arith.constant dense<0xFF800000> : vector<1xf32>
    %123 = vector.multi_reduction <maximumf>, %122, %cst_29 [1] : vector<1x4xf32> to vector<1xf32>
    %124 = vector.shape_cast %123 : vector<1xf32> to vector<1x1xf32>
    %125 = vector.broadcast %124 : vector<1x1xf32> to vector<1x4xf32>
    %126 = arith.subf %122, %125 : vector<1x4xf32>
    %127 = math.exp %126 : vector<1x4xf32>
    %cst_30 = arith.constant dense<0.000000e+00> : vector<1xf32>
    %128 = vector.multi_reduction <add>, %127, %cst_30 [1] : vector<1x4xf32> to vector<1xf32>
    %129 = vector.shape_cast %128 : vector<1xf32> to vector<1x1xf32>
    %130 = math.log %129 : vector<1x1xf32>
    %131 = arith.addf %130, %124 : vector<1x1xf32>
    %132 = vector.broadcast %131 : vector<1x1xf32> to vector<1x4xf32>
    %133 = arith.subf %122, %132 : vector<1x4xf32>
    %c1 = arith.constant 1 : index
    %c0_31 = arith.constant 0 : index
    %134 = vector.load %arg3[%c1, %c0_31] : memref<2x4xf32, #tpu.memory_space<vmem>>, vector<1x4xf32>
    tpu.vector_store %arg3[%c1, %c0_31], %133 {strides = array<i32>} : memref<2x4xf32, #tpu.memory_space<vmem>>, vector<1x4xf32>,
    return
  }
  func.func @transform_0(%arg0: i32) -> (i32, i32) {
    %c0_i32 = arith.constant 0 : i32
    %c0_i32_0 = arith.constant 0 : i32
    %c0_i32_1 = arith.constant 0 : i32
    return %c0_i32, %c0_i32_0 : i32, i32
  }
  func.func @transform_1(%arg0: i32) -> (i32, i32) {
    %c0_i32 = arith.constant 0 : i32
    %c0_i32_0 = arith.constant 0 : i32
    %c0_i32_1 = arith.constant 0 : i32
    return %c0_i32, %c0_i32_0 : i32, i32
  }
  func.func @transform_2(%arg0: i32) -> (i32, i32) {
    %c0_i32 = arith.constant 0 : i32
    %c0_i32_0 = arith.constant 0 : i32
    %c0_i32_1 = arith.constant 0 : i32
    return %c0_i32, %c0_i32_0 : i32, i32
  }
}

</mosaic_0001>

<bundles_post_ra>
// kernel: se_fbcnet_forward.1
= control target key start
LH: loop header
LB: loop body
LE: loop exit
PB: predicated region body
PF: predicated region fallthrough
CT: control target
= control target key end

     0   :  { %vm52_vm0 = vcmask 1043456   ;;  %s831_s0 = inlined_call_operand.vmem [shape: f32[32,36], index: 0, kind: input, shape index: {}]   ;;  %s832_s1 = inlined_call_operand.vmem [shape: f32[184,128], index: 1, kind: input, shape index: {}]   ;;  %s833_s2 = inlined_call_operand.hbm [shape: f32[2,4], index: 2, kind: output, shape index: {}]  }
   0x1   :  { %v16_v0 = vld [vmem:[%s832_s1 + $0x20] sm:$0xf]  ;;  %v15_v1 = vld [vmem:[%s832_s1 + $0x18] sm:$0xff]  ;;  %v14_v2 = vld [vmem:[%s832_s1 + $0x10] sm:$0xff] }
   0x2   :  { %550 = vmatpush.msk.msra.mxu0 %vm52_vm0, %v16_v0  ;;  %v669_v3 = vld [vmem:[%s832_s1 + $0xa8] sm:$0xff] }
   0x3   :  { %v171_v4 = vperm.slane %v669_v3, 2 }
   0x4   :  { %68 = vmatpush.msra.mxu0 %v15_v1 }
   0x5   :  { %7 = vsyncpa [#allocation3], 0  ;;  %v13_v5 = vld [vmem:[%s832_s1 + $0x8] sm:$0xff]  ;;  %s633_s19 = smov 24   ;;  %v12_v6 = vld [vmem:[%s832_s1] sm:$0xff]  ;;  %vm39_vm1 = vcmask 293888  }
   0x6   :  { %69 = vmatpush.msra.mxu0 %v14_v2  ;;  %173 = vrot.lane.b32.xlu0 %v171_v4, %s633_s19  ;;  %v35_v7 = vld [vmem:[%s831_s0] sm:$0xff]  ;;  %v36_v8 = vld [vmem:[%s831_s0 + $0x8] sm:$0xff]  ;;  %v37_v9 = vld [vmem:[%s831_s0 + $0x10] sm:$0xff]  ;;  %s634_s30 = smov 104   ;;  %v184_v26 = vperm.slane %v669_v3, 4  ;;  %s635_s6 = smov 48  }
   0x7   :  { %v38_v10 = vld [vmem:[%s831_s0 + $0x18] sm:$0xff]  ;;  %v18_v18 = vld [vmem:[%s832_s1 + $0x30] sm:$0xff]  ;;  %v85_v27 = vperm.slane %v669_v3, 0  ;;  %v90_v29 = vperm.slane %v669_v3, 1  ;;  %v17_v46 = vld [vmem:[%s832_s1 + $0x28] sm:$0xff]  ;;  %vm218_vm8 = vcmask 195584  }
   0x8   :  { %70 = vmatpush.msra.mxu0 %v13_v5  ;;  %v19_v17 = vld [vmem:[%s832_s1 + $0x38] sm:$0xff]  ;;  %s636_s9 = smov 80   ;;  %s637_s10 = smov 112  }
   0x9   :  { %244 = vmatpush.msra.mxu1 %v19_v17  ;;  %s638_s11 = smov 120   ;;  %s541_s15 = sshll.u32 %s833_s2, 4  ;;  %s542_s15 = int_to_ptr.hbm [resolvable:$true] %s541_s15 }
   0xa   :  { %71 = vmatpush.msra.mxu0 %v12_v6 }
   0xb   :  { %551 = vmatmul.msk.f32.vlgmr.msra.gmra.mxu0 %vm39_vm1, %v35_v7  ;;  %245 = vmatpush.msra.mxu1 %v18_v18 }
   0xd   :  { %246 = vmatpush.msra.mxu1 %v17_v46 }
  0x13   :  { %552 = vmatmul.msk.f32.gmra.mxu0 %vm39_vm1, %v36_v8 }
  0x1b   :  { %553 = vmatmul.msk.f32.gmra.mxu0 %vm39_vm1, %v37_v9 }
  0x23   :  { %554 = vmatmul.msk.f32.gmra.mxu0 %vm39_vm1, %v38_v10 }
  0x78   :  { %v174_v11 = vpop.permute.xlu0 %173 }
  0x88   :  { %v690_v12 = vpop.f32.mrf.mxu0 }
  0x89   :  { %v176_v13 = vadd.f32 %v174_v11, %v690_v12  ;;  %v86_v28 = vmul.f32 %v85_v27, %v690_v12 }
  0x8b   :  { %v180_v14 = vmul.f32 0.1, %v176_v13  ;;  %v91_v30 = vadd.f32 %v90_v29, %v86_v28 }
  0x8d   :  { %201 = vrot.lane.b32.xlu0 %v180_v14, %s634_s30  ;;  %v95_v32 = vsub.f32 0.0, %v91_v30 }
  0x8f   :  { %v99_v33 = vmul.f32 1.442695, %v95_v32 }
  0x90   :  { %v694_v15 = vpop.f32.mrf.mxu0 }
  0x91   :  { %v177_v16 = vadd.f32 %v174_v11, %v694_v15  ;;  %v87_v31 = vmul.f32 %v85_v27, %v694_v15  ;;  %575 = vpow2.f32 %v99_v33 }
  0x93   :  { %v181_v19 = vmul.f32 0.1, %v177_v16  ;;  %v717_v34 = vadd.f32 %v90_v29, %v87_v31 }
  0x95   :  { %203 = vrot.lane.b32.xlu1 %v181_v19, %s634_s30  ;;  %v96_v36 = vsub.f32 0.0, %v717_v34 }
  0x97   :  { %v101_v38 = vmul.f32 1.442695, %v96_v36  ;;  %v576_v39 = vpop.eup %575 }
  0x98   :  { %v704_v20 = vpop.f32.mrf.mxu0  ;;  %v107_v42 = vadd.f32 1.0, %v576_v39 }
  0x99   :  { %v178_v21 = vadd.f32 %v174_v11, %v704_v20  ;;  %v88_v35 = vmul.f32 %v85_v27, %v704_v20  ;;  %577 = vpow2.f32 %v101_v38 }
  0x9a   :  { %579 = vrcp.f32 %v107_v42  ;;  %v122_v63 = vand.u32 2147483648, %v107_v42  ;;  %vm116_vm3 = vweird.f32 %v107_v42  ;;  %v120_v0 = vand.u32 2147483647, %v107_v42 }
  0x9b   :  { %v182_v22 = vmul.f32 0.1, %v178_v21  ;;  %v721_v37 = vadd.f32 %v90_v29, %v88_v35 }
  0x9c   :  { %v123_v5 = vor.u32 1.1754944e-38, %v122_v63  ;;  %vm121_vm5 = vcmp.eq.f32.partialorder %v120_v0, 8.507059e+37 }
  0x9d   :  { %205 = vrot.lane.b32.xlu1 %v182_v22, %s634_s30  ;;  %v97_v41 = vsub.f32 0.0, %v721_v37 }
  0x9f   :  { %v103_v44 = vmul.f32 1.442695, %v97_v41  ;;  %v578_v45 = vpop.eup %577 }
  0xa0   :  { %v708_v23 = vpop.f32.mrf.mxu0  ;;  %v108_v48 = vadd.f32 1.0, %v578_v45  ;;  %v580_v49 = vpop.eup %579 }
  0xa1   :  { %v179_v24 = vadd.f32 %v174_v11, %v708_v23  ;;  %v89_v40 = vmul.f32 %v85_v27, %v708_v23  ;;  %581 = vpow2.f32 %v103_v44  ;;  %v112_v52 = vmul.f32 %v580_v49, %v107_v42 }
  0xa2   :  { %583 = vrcp.f32 %v108_v48  ;;  %vm117_vm2 = vweird.f32 %v580_v49  ;;  %v137_v10 = vand.u32 2147483648, %v108_v48  ;;  %vm131_vm7 = vweird.f32 %v108_v48 }
  0xa3   :  { %v183_v25 = vmul.f32 0.1, %v179_v24  ;;  %v725_v43 = vadd.f32 %v90_v29, %v89_v40  ;;  %v113_v54 = vsub.f32 1.0, %v112_v52  ;;  %vm118_vm4 = vmor %vm116_vm3, %vm117_vm2  ;;  %v135_v13 = vand.u32 2147483647, %v108_v48 }
  0xa4   :  { %v138_v22 = vor.u32 1.1754944e-38, %v137_v10 }
  0xa5   :  { %207 = vrot.lane.b32.xlu2 %v183_v25, %s634_s30  ;;  %v98_v47 = vsub.f32 0.0, %v725_v43  ;;  %v114_v57 = vmul.f32 %v580_v49, %v113_v54  ;;  %vm136_vm10 = vcmp.eq.f32.partialorder %v135_v13, 8.507059e+37 }
  0xa7   :  { %v105_v50 = vmul.f32 1.442695, %v98_v47  ;;  %v582_v51 = vpop.eup %581  ;;  %v115_v61 = vadd.f32 %v580_v49, %v114_v57 }
  0xa8   :  { %v109_v53 = vadd.f32 1.0, %v582_v51  ;;  %v584_v55 = vpop.eup %583 }
  0xa9   :  { %585 = vpow2.f32 %v105_v50  ;;  %v127_v58 = vmul.f32 %v584_v55, %v108_v48  ;;  %v119_v2 = vsel %vm118_vm4, %v580_v49, %v115_v61  ;;  %vm132_vm6 = vweird.f32 %v584_v55 }
  0xaa   :  { %587 = vrcp.f32 %v109_v53  ;;  %v124_v6 = vsel %vm121_vm5, %v123_v5, %v119_v2  ;;  %vm133_vm9 = vmor %vm131_vm7, %vm132_vm6  ;;  %vm146_vm12 = vweird.f32 %v109_v53  ;;  %v150_v27 = vand.u32 2147483647, %v109_v53 }
  0xab   :  { %v128_v62 = vsub.f32 1.0, %v127_v58  ;;  %v125_v11 = vmul.f32 %v124_v6, %v91_v30  ;;  %v152_v28 = vand.u32 2147483648, %v109_v53  ;;  %v217_v58 = vperm.slane %v669_v3, 3  ;;  %v24_v30 = vld [vmem:[%s832_s1 + $0x60] sm:$0xff] }
  0xac   :  { %vm151_vm15 = vcmp.eq.f32.partialorder %v150_v27, 8.507059e+37  ;;  %vm284_vm4 = vcmask 523264   ;;  %v21_v27 = vld [vmem:[%s832_s1 + $0x48] sm:$0xff]  ;;  %vm321_vm5 = vcmask 31744   ;;  %vm403_vm6 = vcmask 261120  }
  0xad   :  { %186 = vrot.lane.b32.xlu2 %v184_v26, %s635_s6  ;;  %v129_v4 = vmul.f32 %v584_v55, %v128_v62 }
  0xaf   :  { %v586_v56 = vpop.eup %585  ;;  %v130_v9 = vadd.f32 %v584_v55, %v129_v4 }
  0xb0   :  { %v731_v59 = vadd.f32 1.0, %v586_v56  ;;  %v588_v60 = vpop.eup %587 }
  0xb1   :  { %v142_v1 = vmul.f32 %v588_v60, %v109_v53  ;;  %v134_v21 = vsel %vm133_vm9, %v584_v55, %v130_v9  ;;  %vm147_vm11 = vweird.f32 %v588_v60 }
  0xb2   :  { %589 = vrcp.f32 %v731_v59  ;;  %v139_v25 = vsel %vm136_vm10, %v138_v22, %v134_v21  ;;  %vm740_vm13 = vmor %vm146_vm12, %vm147_vm11  ;;  %vm161_vm14 = vweird.f32 %v731_v59  ;;  %v167_v45 = vand.u32 2147483648, %v731_v59 }
  0xb3   :  { %v143_v7 = vsub.f32 1.0, %v142_v1  ;;  %v140_v29 = vmul.f32 %v139_v25, %v717_v34  ;;  %v153_v34 = vor.u32 1.1754944e-38, %v152_v28  ;;  %v22_v28 = vld [vmem:[%s832_s1 + $0x50] sm:$0xff]  ;;  %vm474_vm11 = vcmask 257024  }
  0xb4   :  { %v168_v48 = vor.u32 1.1754944e-38, %v167_v45  ;;  %vm511_vm12 = vcmask 62501  }
  0xb5   :  { %v144_v18 = vmul.f32 %v588_v60, %v143_v7 }
  0xb7   :  { %v145_v26 = vadd.f32 %v588_v60, %v144_v18 }
  0xb8   :  { %v734_v8 = vpop.eup %589 }
  0xb9   :  { %v157_v17 = vmul.f32 %v734_v8, %v731_v59  ;;  %v149_v35 = vsel %vm740_vm13, %v588_v60, %v145_v26  ;;  %vm162_vm1 = vweird.f32 %v734_v8  ;;  %vm496_vm13 = vcmask 29701  }
  0xba   :  { %v154_v46 = vsel %vm151_vm15, %v153_v34, %v149_v35  ;;  %vm163_vm2 = vmor %vm161_vm14, %vm162_vm1 }
  0xbb   :  { %v158_v24 = vsub.f32 1.0, %v157_v17 }
  0xbd   :  { %v159_v31 = vmul.f32 %v734_v8, %v158_v24 }
  0xff   :  { %v202_v14 = vpop.permute.xlu0 %201  ;;  %v208_v16 = vpop.permute.xlu2 %207 }
 0x100   :  { %v213_v19 = vadd.f32 %v202_v14, %v125_v11  ;;  %v20_v11 = vld [vmem:[%s832_s1 + $0x40] sm:$0xff] }
 0x102   :  { %555 = vmatmul.msk.f32.vlgmr.msra.gmra.mxu1 %vm218_vm8, %v213_v19 }
 0x107   :  { %v204_v32 = vpop.permute.xlu1 %203  ;;  %v187_v33 = vpop.permute.xlu2 %186 }
 0x108   :  { %v214_v36 = vadd.f32 %v204_v32, %v140_v29  ;;  %v192_v38 = vadd.f32 %v187_v33, %v708_v23  ;;  %v191_v39 = vadd.f32 %v187_v33, %v704_v20  ;;  %v190_v40 = vadd.f32 %v187_v33, %v694_v15  ;;  %v23_v29 = vld [vmem:[%s832_s1 + $0x58] sm:$0xff] }
 0x109   :  { %v160_v23 = vadd.f32 %v734_v8, %v159_v31  ;;  %v165_v20 = vand.u32 2147483647, %v731_v59  ;;  %v155_v15 = vmul.f32 %v154_v46, %v721_v37  ;;  %v189_v47 = vadd.f32 %v187_v33, %v690_v12 }
 0x10a   :  { %556 = vmatmul.msk.f32.gmra.mxu1 %vm218_vm8, %v214_v36  ;;  %v196_v41 = vmul.f32 0.1, %v192_v38  ;;  %v195_v42 = vmul.f32 0.1, %v191_v39  ;;  %v194_v44 = vmul.f32 0.1, %v190_v40 }
 0x10b   :  { %v164_v50 = vsel %vm163_vm2, %v734_v8, %v160_v23  ;;  %vm166_vm3 = vcmp.eq.f32.partialorder %v165_v20, 8.507059e+37  ;;  %v193_v52 = vmul.f32 0.1, %v189_v47  ;;  %v371_v33 = vperm.slane %v669_v3, 6  ;;  %v786_v38 = vld [vmem:[%s832_s1 + $0xb0] sm:$0xff] }
 0x10c   :  { %270 = vrot.lane.b32.xlu0 %v196_v41, %s636_s9  ;;  %268 = vrot.lane.b32.xlu1 %v195_v42, %s636_s9  ;;  %v169_v53 = vsel %vm166_vm3, %v168_v48, %v164_v50  ;;  %v365_v36 = vperm.slane %v669_v3, 5  ;;  %v374_v40 = vperm.slane %v786_v38, 1  ;;  %v368_v41 = vperm.slane %v786_v38, 0 }
 0x10d   :  { %266 = vrot.lane.b32.xlu2 %v194_v44, %s636_s9  ;;  %v170_v54 = vmul.f32 %v169_v53, %v725_v43  ;;  %v31_v53 = vld [vmem:[%s832_s1 + $0x98] sm:$0xff] }
 0x10f   :  { %v206_v49 = vpop.permute.xlu1 %205  ;;  %v216_v55 = vadd.f32 %v208_v16, %v170_v54 }
 0x110   :  { %v215_v51 = vadd.f32 %v206_v49, %v155_v15 }
 0x112   :  { %557 = vmatmul.msk.f32.gmra.mxu1 %vm218_vm8, %v215_v51 }
 0x114   :  { %264 = vrot.lane.b32.xlu0 %v193_v52, %s636_s9 }
 0x11a   :  { %558 = vmatmul.msk.f32.gmra.mxu1 %vm218_vm8, %v216_v55 }
 0x167   :  { %v267_v2 = vpop.permute.xlu2 %266 }
 0x17e   :  { %v271_v12 = vpop.permute.xlu0 %270  ;;  %v269_v63 = vpop.permute.xlu1 %268 }
 0x17f   :  { %v248_v56 = vpop.f32.mrf.mxu1 }
 0x180   :  { %v249_v5 = vadd.f32 %v248_v56, %v217_v58 }
 0x186   :  { %v265_v4 = vpop.permute.xlu0 %264 }
 0x187   :  { %v251_v37 = vpop.f32.mrf.mxu1  ;;  %v276_v7 = vadd.f32 %v265_v4, %v249_v5 }
 0x188   :  { %v252_v61 = vadd.f32 %v251_v37, %v217_v58 }
 0x189   :  { %v280_v10 = vmul.f32 %v276_v7, %v276_v7 }
 0x18a   :  { %v277_v43 = vadd.f32 %v267_v2, %v252_v61  ;;  %v377_v61 = vperm.slane %v669_v3, 7  ;;  %v30_v3 = vld [vmem:[%s832_s1 + $0x90] sm:$0xff] }
 0x18c   :  { %v281_v9 = vmul.f32 %v277_v43, %v277_v43 }
 0x18f   :  { %v254_v57 = vpop.f32.mrf.mxu1 }
 0x190   :  { %v255_v59 = vadd.f32 %v254_v57, %v217_v58 }
 0x192   :  { %v278_v0 = vadd.f32 %v269_v63, %v255_v59 }
 0x194   :  { %v282_v8 = vmul.f32 %v278_v0, %v278_v0 }
 0x197   :  { %v257_v60 = vpop.f32.mrf.mxu1 }
 0x198   :  { %v258_v62 = vadd.f32 %v257_v60, %v217_v58 }
 0x19a   :  { %v279_v1 = vadd.f32 %v271_v12, %v258_v62 }
 0x19c   :  { %v283_v6 = vmul.f32 %v279_v1, %v279_v1 }
 0x19e   :  { %296 = vmatpush.msra.mxu2 %v283_v6 }
 0x1a0   :  { %297 = vmatpush.msra.mxu2 %v282_v8  ;;  %v29_v8 = vld [vmem:[%s832_s1 + $0x88] sm:$0xff] }
 0x1a2   :  { %298 = vmatpush.msra.mxu2 %v281_v9  ;;  %v28_v9 = vld [vmem:[%s832_s1 + $0x80] sm:$0xff] }
 0x1a4   :  { %299 = vmatpush.msra.mxu2 %v280_v10  ;;  %v27_v10 = vld [vmem:[%s832_s1 + $0x78] sm:$0xff] }
 0x1a6   :  { %300 = vmatpush.msra.mxu2 %v279_v1 }
 0x1a8   :  { %301 = vmatpush.msra.mxu2 %v278_v0  ;;  %v380_v0 = vperm.slane %v786_v38, 2 }
 0x1aa   :  { %302 = vmatpush.msra.mxu2 %v277_v43 }
 0x1ac   :  { %303 = vmatpush.msra.mxu2 %v276_v7  ;;  %v25_v7 = vld [vmem:[%s832_s1 + $0x68] sm:$0xff] }
 0x1ad   :  { %559 = vmatmul.msk.f32.vlgmr.msra.gmra.mxu2 %vm284_vm4, %v20_v11  ;;  %v26_v11 = vld [vmem:[%s832_s1 + $0x70] sm:$0xff] }
 0x230   :  { %v305_v13 = vpop.f32.mrf.mxu2 }
 0x231   :  { %v308_v14 = vmul.f32 0.125, %v305_v13 }
 0x233   :  { %v309_v16 = vmul.f32 %v308_v14, %v305_v13 }
 0x235   :  { %v311_v17 = vrot.slane %v309_v16, 4 }
 0x237   :  { %v313_v18 = vsub.f32 %v305_v13, %v311_v17 }
 0x239   :  { %v314_v19 = vmul.f32 0.14285715, %v313_v18 }
 0x23b   :  { %v315_v21 = vmax.f32 %v314_v19, 1e-06 }
 0x23d   :  { %v316_v22 = vmin.f32 %v315_v21, 1000000.0 }
 0x23f   :  { %591 = vlog2.f32 %v316_v22 }
 0x245   :  { %v592_v24 = vpop.eup %591 }
 0x246   :  { %v318_v25 = vmul.f32 0.6931472, %v592_v24 }
 0x248   :  { %v320_v26 = vrot.slane %v318_v25, 4 }
 0x24a   :  { %560 = vmatpush.msk.msra.mxu3 %vm52_vm0, %v320_v26  ;;  %vm385_vm0 = vcmask 392192  }
 0x24b   :  { %561 = vmatmul.msk.f32.vlgmr.msra.gmra.mxu3 %vm321_vm5, %v21_v27  ;;  %v445_v27 = vperm.slane %v786_v38, 3 }
 0x24c   :  { %463 = vmatpush.msrb.mxu3 %v31_v53 }
 0x24e   :  { %464 = vmatpush.msrb.mxu3 %v30_v3 }
 0x250   :  { %465 = vmatpush.msrb.mxu3 %v29_v8 }
 0x252   :  { %466 = vmatpush.msrb.mxu3 %v28_v9 }
 0x253   :  { %562 = vmatmul.msk.f32.gmra.mxu3 %vm321_vm5, %v22_v28 }
 0x254   :  { %467 = vmatpush.msrb.mxu3 %v27_v10 }
 0x256   :  { %468 = vmatpush.msrb.mxu3 %v26_v11 }
 0x25b   :  { %563 = vmatmul.msk.f32.gmra.mxu3 %vm321_vm5, %v23_v29 }
 0x263   :  { %564 = vmatmul.msk.f32.gmra.mxu3 %vm321_vm5, %v24_v30  ;;  %v447_v30 = vperm.slane %v786_v38, 4 }
 0x2ce   :  { %v353_v31 = vpop.f32.mrf.mxu3 }
 0x2cf   :  { %v366_v34 = vmul.f32 %v365_v36, %v353_v31 }
 0x2d1   :  { %v369_v46 = vadd.f32 %v368_v41, %v366_v34 }
 0x2d6   :  { %v356_v32 = vpop.f32.mrf.mxu3 }
 0x2d7   :  { %v367_v42 = vmul.f32 %v365_v36, %v356_v32 }
 0x2d9   :  { %v370_v20 = vadd.f32 %v368_v41, %v367_v42 }
 0x2de   :  { %v359_v35 = vpop.f32.mrf.mxu3 }
 0x2df   :  { %v372_v39 = vmul.f32 %v371_v33, %v359_v35  ;;  %v378_v63 = vmul.f32 %v377_v61, %v359_v35  ;;  %v32_v35 = vld [vmem:[%s832_s1 + $0xa0] sm:$0xf]  ;;  %s639_s1 = smov 124  }
 0x2e1   :  { %v375_v44 = vadd.f32 %v374_v40, %v372_v39  ;;  %v381_v43 = vadd.f32 %v380_v0, %v378_v63 }
 0x2e3   :  { %v383_v15 = vmul.f32 %v375_v44, %v369_v46 }
 0x2e5   :  { %v386_v49 = vsel %vm385_vm0, %v383_v15, -inf }
 0x2e6   :  { %v362_v45 = vpop.f32.mrf.mxu3 }
 0x2e7   :  { %v373_v23 = vmul.f32 %v371_v33, %v362_v45  ;;  %v379_v62 = vmul.f32 %v377_v61, %v362_v45 }
 0x2e9   :  { %v376_v47 = vadd.f32 %v374_v40, %v373_v23  ;;  %v382_v1 = vadd.f32 %v380_v0, %v379_v62 }
 0x2eb   :  { %v384_v48 = vmul.f32 %v376_v47, %v370_v20 }
 0x2ed   :  { %v387_v50 = vsel %vm385_vm0, %v384_v48, -inf }
 0x2ee   :  { %v388_v51 = vmax.f32 %v386_v49, %v387_v50 }
 0x2f0   :  { %v389_v52 = vrot.slane %v388_v51, 4 }
 0x2f2   :  { %v390_v54 = vmax.f32 %v388_v51, %v389_v52 }
 0x2f4   :  { %v391_v55 = vrot.slane %v390_v54, 2 }
 0x2f6   :  { %v392_v56 = vmax.f32 %v390_v54, %v391_v55 }
 0x2f8   :  { %v393_v37 = vrot.slane %v392_v56, 1 }
 0x2fa   :  { %v394_v57 = vmax.f32 %v392_v56, %v393_v37 }
 0x2fc   :  { %v396_v12 = vsub.f32 %v384_v48, %v394_v57  ;;  %v395_v58 = vsub.f32 %v383_v15, %v394_v57 }
 0x2fe   :  { %v399_v59 = vmul.f32 1.442695, %v396_v12  ;;  %v397_v60 = vmul.f32 1.442695, %v395_v58 }
 0x300   :  { %593 = vpow2.f32 %v399_v59 }
 0x301   :  { %595 = vpow2.f32 %v397_v60 }
 0x306   :  { %v594_v2 = vpop.eup %593 }
 0x307   :  { %v596_v4 = vpop.eup %595  ;;  %v402_v5 = vmul.f32 %v594_v2, %v382_v1 }
 0x308   :  { %v401_v6 = vmul.f32 %v596_v4, %v381_v43 }
 0x309   :  { %419 = vmatpush.msrb.mxu2 %v402_v5 }
 0x30b   :  { %420 = vmatpush.msrb.mxu2 %v401_v6 }
 0x30d   :  { %421 = vmatpush.msrb.mxu2 %v594_v2 }
 0x30f   :  { %422 = vmatpush.msrb.mxu2 %v596_v4 }
 0x310   :  { %565 = vmatmul.msk.f32.vlgmr.msrb.gmra.mxu2 %vm403_vm6, %v25_v7 }
 0x393   :  { %v424_v13 = vpop.f32.mrf.mxu2 }
 0x394   :  { %v428_v14 = vrot.slane %v424_v13, 4 }
 0x396   :  { %597 = vrcp.f32 %v428_v14  ;;  %v441_v19 = vand.u32 2147483648, %v428_v14  ;;  %v439_v22 = vand.u32 2147483647, %v428_v14  ;;  %vm435_vm8 = vweird.f32 %v428_v14 }
 0x398   :  { %v442_v25 = vor.u32 1.1754944e-38, %v441_v19  ;;  %vm440_vm10 = vcmp.eq.f32.partialorder %v439_v22, 8.507059e+37 }
 0x39c   :  { %v598_v16 = vpop.eup %597 }
 0x39d   :  { %v431_v17 = vmul.f32 %v598_v16, %v428_v14  ;;  %vm436_vm7 = vweird.f32 %v598_v16 }
 0x39e   :  { %vm437_vm9 = vmor %vm435_vm8, %vm436_vm7 }
 0x39f   :  { %v432_v18 = vsub.f32 1.0, %v431_v17 }
 0x3a1   :  { %v433_v21 = vmul.f32 %v598_v16, %v432_v18 }
 0x3a3   :  { %v434_v24 = vadd.f32 %v598_v16, %v433_v21 }
 0x3a5   :  { %v438_v26 = vsel %vm437_vm9, %v598_v16, %v434_v24 }
 0x3a6   :  { %v443_v28 = vsel %vm440_vm10, %v442_v25, %v438_v26 }
 0x3a7   :  { %v444_v29 = vmul.f32 %v443_v28, %v424_v13 }
 0x3a9   :  { %v446_v31 = vmul.f32 %v445_v27, %v444_v29 }
 0x3ab   :  { %v448_v32 = vadd.f32 %v447_v30, %v446_v31 }
 0x3ad   :  { %v450_v33 = vrot.slane %v448_v32, 4 }
 0x3af   :  { %566 = vmatmul.msk.f32.vlgmr.msrb.gmra.mxu3 %vm385_vm0, %v450_v33 }
 0x432   :  { %v470_v36 = vpop.f32.mrf.mxu3 }
 0x433   :  { %v473_v39 = vmul.f32 %v470_v36, %v32_v35 }
 0x435   :  { %v475_v40 = vsel %vm474_vm11, %v473_v39, 0.0 }
 0x436   :  { %v476_v34 = vrot.slane %v475_v40, 4 }
 0x438   :  { %v477_v41 = vadd.f32 %v476_v34, %v475_v40 }
 0x43a   :  { %v478_v42 = vrot.slane %v477_v41, 2 }
 0x43c   :  { %v479_v44 = vadd.f32 %v478_v42, %v477_v41 }
 0x43e   :  { %v480_v45 = vrot.slane %v479_v44, 1 }
 0x440   :  { %v481_v46 = vadd.f32 %v480_v45, %v479_v44 }
 0x442   :  { %492 = vrot.lane.b32.xlu0 %v481_v46, %s634_s30  ;;  %488 = vrot.lane.b32.xlu2 %v481_v46, %s637_s10  ;;  %v482_v23 = vadd.f32 %v481_v46, %v786_v38  ;;  %s640_s30 = smov [#allocation2]  }
 0x443   :  { %484 = vrot.lane.b32.xlu1 %v481_v46, %s638_s11  ;;  %s539_s12 = sshll.u32 %s640_s30, 4  ;;  %s540_s12 = int_to_ptr.vmem [resolvable:$true] %s539_s12 }
 0x49c   :  { %v489_v47 = vpop.permute.xlu2 %488 }
 0x4b4   :  { %v493_v49 = vpop.permute.xlu0 %492 }
 0x4b5   :  { %v485_v20 = vpop.permute.xlu1 %484 }
 0x4b6   :  { %v487_v15 = vadd.f32 %v485_v20, %v482_v23 }
 0x4b8   :  { %v491_v48 = vadd.f32 %v489_v47, %v487_v15 }
 0x4ba   :  { %v495_v50 = vadd.f32 %v493_v49, %v491_v48 }
 0x4bc   :  { %v512_v51 = vsel %vm511_vm12, %v495_v50, -inf  ;;  %v497_v52 = vsel %vm496_vm13, %v495_v50, -inf }
 0x4bd   :  { %513 = vmax.xlane.f32.xlu1 %v512_v51  ;;  %498 = vmax.xlane.f32.xlu0 %v497_v52 }
 0x530   :  { %v514_v53 = vpop.xlane.xlu1 %513  ;;  %v499_v54 = vpop.xlane.xlu0 %498 }
 0x531   :  { %v515_v55 = vsub.f32 %v495_v50, %v514_v53  ;;  %v500_v56 = vsub.f32 %v495_v50, %v499_v54 }
 0x533   :  { %v516_v37 = vmul.f32 1.442695, %v515_v55  ;;  %v501_v57 = vmul.f32 1.442695, %v500_v56 }
 0x535   :  { %599 = vpow2.f32 %v516_v37 }
 0x536   :  { %601 = vpow2.f32 %v501_v57 }
 0x53b   :  { %v600_v38 = vpop.eup %599 }
 0x53c   :  { %v602_v12 = vpop.eup %601  ;;  %519 = vrot.lane.b32.xlu2 %v600_v38, %s639_s1 }
 0x53d   :  { %v503_v58 = vsel %vm496_vm13, %v602_v12, 0.0 }
 0x53e   :  { %504 = vadd.xlane.f32.xlu1 %v503_v58 }
 0x596   :  { %v520_v59 = vpop.permute.xlu2 %519 }
 0x597   :  { %v522_v60 = vsel %vm496_vm13, %v520_v59, 0.0 }
 0x598   :  { %523 = vadd.xlane.f32.xlu2 %v522_v60 }
 0x5b1   :  { %v505_v61 = vpop.xlane.xlu1 %504 }
 0x5b2   :  { %603 = vlog2.f32 %v505_v61 }
 0x5b8   :  { %v604_v62 = vpop.eup %603 }
 0x5b9   :  { %v507_v63 = vmul.f32 0.6931472, %v604_v62 }
 0x5bb   :  { %v508_v0 = vadd.f32 %v507_v63, %v499_v54 }
 0x5bd   :  { %v509_v1 = vsub.f32 %v495_v50, %v508_v0 }
 0x5bf   :  { %510 = vst.msk [vmem:[#allocation2 - $0x5] sm:$0x20] %vm496_vm13, %v509_v1 }
 0x60b   :  { %v524_v2 = vpop.xlane.xlu2 %523 }
 0x60c   :  { %605 = vlog2.f32 %v524_v2 }
 0x612   :  { %v606_v4 = vpop.eup %605 }
 0x613   :  { %v526_v5 = vmul.f32 0.6931472, %v606_v4 }
 0x615   :  { %v527_v43 = vadd.f32 %v526_v5, %v514_v53 }
 0x617   :  { %v528_v6 = vsub.f32 %v495_v50, %v527_v43 }
 0x619   :  { %530 = vrot.lane.b32.xlu2 %v528_v6, %s639_s1 }
 0x673   :  { %v531_v7 = vpop.permute.xlu2 %530 }
 0x674   :  { %533 = vst.msk [vmem:[#allocation2 - $0x4] sm:$0x20] %vm496_vm13, %v531_v7 }
 0x675   :  { %544 = dma.vmem_to_hbm [thread:$0]  %s540_s12, 32, %s542_s15, [#allocation3]  }
 0x676   :  { %631 = dma.done.wait [#allocation3], 32  }
 0x677   :  { %632 = vsyncadd [#allocation3], 4294967264 }
 0x678   :  { %549 = vsyncpa [#allocation3], 1 }

</bundles_post_ra>
